<compile_context>
chip_gen: v5e
topology: v5e:2x2
jax: 0.10.0
libtpu: 0.0.40
codegen_flags: <defaults>
</compile_context>

<pallas_src>
import jax
import jax.numpy as jnp
from jax.experimental import pallas as pl
from jax.experimental.pallas import tpu as pltpu


def _round_up(n: int, m: int) -> int:
    return ((n + m - 1) // m) * m


def mlp_forward_kernel(x_ref, w1_ref, b1_ref, w2r_ref, b2_ref, o_ref):
    """Fused: (x @ W1 + b1) -> ReLU -> rowwise dot with w2 (+ b2)."""
    # First layer on the MXU: bf16 operands, f32 accumulate.
    x = x_ref[...].astype(jnp.bfloat16)                    # [TB, in]
    w1 = w1_ref[...].astype(jnp.bfloat16)                  # [in, hidden]
    h = jnp.dot(x, w1, preferred_element_type=jnp.float32)  # [TB, hidden] f32
    # Bias + ReLU in f32 (safe on v5e's non-bf16 VPU).
    h = jnp.maximum(h + b1_ref[...], 0.0)
    # Second layer with out_features == 1: skip the N=1 MXU matmul.
    # VPU multiply + XLU lane-reduce; b2 is a scalar from SMEM.
    o = jnp.sum(h * w2r_ref[...], axis=-1, keepdims=True) + b2_ref[0]  # [TB, 1]
    # Single whole-tile store (one vst per grid step, not per row).
    o_ref[...] = o.astype(o_ref.dtype)


def baseline_model_forward(x, w1, b1, w2, b2, *, tb=512):
    """Pallas equivalent of PyTorchBaselineModel.forward(batch).

    x:  [B, in_features] float32
    w1: [in_features, hidden], b1: [hidden]
    w2: [hidden, 1],           b2: [1]
    Returns: squeeze of [B, 1]  (=> [B]).
    """
    B, in_features = x.shape
    hidden = w1.shape[1]
    out_features = w2.shape[1]
    assert out_features == 1, "kernel specialized for the baseline regression head"

    # Batch tile: multiple of 8 (f32 sublane). Large tiles (>=512) once B grows,
    # minimal padding for small B.  VMEM footprint per step is tiny here
    # (x tile 2*TB*in*4 B + weights < 1 MiB), well under v7x's 64 MiB.
    tb = min(tb, _round_up(B, 8))
    tb = _round_up(tb, 8)
    b_pad = _round_up(B, tb)
    if b_pad != B:
        x = jnp.pad(x, ((0, b_pad - B), (0, 0)))
    num_tiles = b_pad // tb

    w2_row = jnp.reshape(w2, (1, hidden))   # [1, hidden] row for the VPU path
    b1_row = jnp.reshape(b1, (1, hidden))
    b2_s = jnp.reshape(b2, (1,))            # scalar -> SMEM

    cost = pl.CostEstimate(
        flops=2 * b_pad * in_features * hidden + 4 * b_pad * hidden,
        transcendentals=0,
        bytes_accessed=4 * (b_pad * in_features + in_features * hidden
                            + 2 * hidden + 1 + b_pad),
    )

    out = pl.pallas_call(
        mlp_forward_kernel,
        out_shape=jax.ShapeDtypeStruct((b_pad, 1), jnp.float32),
        grid=(num_tiles,),
        in_specs=[
            pl.BlockSpec((tb, in_features), lambda i: (i, 0)),      # x: batch-tiled
            pl.BlockSpec((in_features, hidden), lambda i: (0, 0)),  # W1 resident
            pl.BlockSpec((1, hidden), lambda i: (0, 0)),            # b1 resident
            pl.BlockSpec((1, hidden), lambda i: (0, 0)),            # w2 row resident
            pl.BlockSpec(memory_space=pltpu.MemorySpace.SMEM),      # b2 scalar
        ],
        out_specs=pl.BlockSpec((tb, 1), lambda i: (i, 0)),
        compiler_params=pltpu.CompilerParams(
            dimension_semantics=("parallel",),  # v7x: shard tiles across 2 TCs
        ),
        cost_estimate=cost,
    )(x, w1, b1_row, w2_row, b2_s)

    if b_pad != B:
        out = out[:B]
    # .squeeze() semantics: drop size-1 dims (out_features == 1 -> [B]).
    return jnp.squeeze(out)


def init_params(key, in_features, hidden, out_features):
    """Deterministic init mimicking nn.Linear's default U(-1/sqrt(fan_in), .)."""
    k1, k2, k3, k4 = jax.random.split(key, 4)
    bound1 = 1.0 / jnp.sqrt(in_features)
    bound2 = 1.0 / jnp.sqrt(hidden)
    # Stored as [in, out] (transpose of PyTorch's [out, in]) for direct matmul.
    w1 = jax.random.uniform(k1, (in_features, hidden), jnp.float32, -bound1, bound1)
    b1 = jax.random.uniform(k2, (hidden,), jnp.float32, -bound1, bound1)
    w2 = jax.random.uniform(k3, (hidden, out_features), jnp.float32, -bound2, bound2)
    b2 = jax.random.uniform(k4, (out_features,), jnp.float32, -bound2, bound2)
    return w1, b1, w2, b2


if __name__ == "__main__":
    # Small shapes consistent with the module; B large enough to exercise the
    # batch-tiled grid (2 tiles of 512 rows).
    B, IN_FEATURES, HIDDEN, OUT_FEATURES = 1024, 32, 128, 1

    key = jax.random.PRNGKey(0)
    kx, kp = jax.random.split(key)
    x = jax.random.normal(kx, (B, IN_FEATURES), jnp.float32)
    w1, b1, w2, b2 = init_params(kp, IN_FEATURES, HIDDEN, OUT_FEATURES)

    y = baseline_model_forward(x, w1, b1, w2, b2)
    y = jax.block_until_ready(y)

    # Pure-JAX reference mirroring the kernel numerics:
    # bf16 MXU matmul with f32 accumulate, f32 bias/ReLU, f32 rowwise reduce.
    h_ref = jnp.maximum(
        jnp.dot(x.astype(jnp.bfloat16), w1.astype(jnp.bfloat16),
                preferred_element_type=jnp.float32) + b1, 0.0)
    ref = jnp.squeeze(
        jnp.sum(h_ref * w2.reshape(1, -1), axis=-1, keepdims=True) + b2)

    assert y.shape == (B,), y.shape
    assert jnp.allclose(y, ref, atol=1e-4, rtol=1e-4), \
        float(jnp.max(jnp.abs(y - ref)))

    # TODO(synk): run_train / mse_eval / reset_weights (AdamW loop, MSE loss
    # backward, weight re-init) are host-side training logic, not part of the
    # forward kernel.
    print("KERNEL_OK")
</pallas_src>

<mosaic_0001>
module attributes {stable_mosaic.version = 11 : i64} {
  func.func @mlp_forward_kernel(%arg0: i32, %arg1: memref<512x32xf32, #tpu.memory_space<vmem>>, %arg2: memref<32x128xf32, #tpu.memory_space<vmem>>, %arg3: memref<1x128xf32, #tpu.memory_space<vmem>>, %arg4: memref<1x128xf32, #tpu.memory_space<vmem>>, %arg5: memref<1xf32, #tpu.memory_space<smem>>, %arg6: memref<512x1xf32, #tpu.memory_space<vmem>>) attributes {dimension_semantics = [#tpu.dimension_semantics<parallel>], iteration_bounds = array<i64: 2>, scalar_prefetch = 0 : i64, scratch_operands = 0 : i64, tpu.core_type = #tpu.core_type<tc>, window_params = [{transform_indices = @transform_0, window_bounds = array<i64: 512, 32>}, {pipeline_mode = #tpu.pipeline_mode<synchronous>, transform_indices = @transform_1, window_bounds = array<i64: 32, 128>}, {pipeline_mode = #tpu.pipeline_mode<synchronous>, transform_indices = @transform_2, window_bounds = array<i64: 1, 128>}, {pipeline_mode = #tpu.pipeline_mode<synchronous>, transform_indices = @transform_3, window_bounds = array<i64: 1, 128>}, {transform_indices = @transform_4, window_bounds = array<i64: 1>}, {transform_indices = @transform_5, window_bounds = array<i64: 512, 1>}]} {
    %c0 = arith.constant 0 : index
    %c0_0 = arith.constant 0 : index
    %0 = vector.load %arg1[%c0, %c0_0] : memref<512x32xf32, #tpu.memory_space<vmem>>, vector<512x32xf32>
    %1 = arith.truncf %0 : vector<512x32xf32> to vector<512x32xbf16>
    %c0_1 = arith.constant 0 : index
    %c0_2 = arith.constant 0 : index
    %2 = vector.load %arg2[%c0_1, %c0_2] : memref<32x128xf32, #tpu.memory_space<vmem>>, vector<32x128xf32>
    %3 = arith.truncf %2 : vector<32x128xf32> to vector<32x128xbf16>
    %cst = arith.constant dense<0.000000e+00> : vector<512x128xf32>
    %4 = tpu.matmul %1, %3, %cst {dimension_numbers = #tpu.dot_dimension_numbers<[1], [0], [0], [1], [0, 0, 1, 1], [], []>} : vector<512x32xbf16>, vector<32x128xbf16>, vector<512x128xf32> -> vector<512x128xf32>
    %c0_3 = arith.constant 0 : index
    %c0_4 = arith.constant 0 : index
    %5 = vector.load %arg3[%c0_3, %c0_4] : memref<1x128xf32, #tpu.memory_space<vmem>>, vector<1x128xf32>
    %6 = vector.broadcast %5 : vector<1x128xf32> to vector<512x128xf32>
    %7 = arith.addf %4, %6 : vector<512x128xf32>
    %cst_5 = arith.constant 0.000000e+00 : f32
    %8 = vector.broadcast %cst_5 : f32 to vector<512x128xf32>
    %9 = arith.maximumf %7, %8 : vector<512x128xf32>
    %c0_6 = arith.constant 0 : index
    %c0_7 = arith.constant 0 : index
    %10 = vector.load %arg4[%c0_6, %c0_7] : memref<1x128xf32, #tpu.memory_space<vmem>>, vector<1x128xf32>
    %11 = vector.broadcast %10 : vector<1x128xf32> to vector<512x128xf32>
    %12 = arith.mulf %9, %11 : vector<512x128xf32>
    %cst_8 = arith.constant dense<0.000000e+00> : vector<512xf32>
    %13 = vector.multi_reduction <add>, %12, %cst_8 [1] : vector<512x128xf32> to vector<512xf32>
    %14 = vector.shape_cast %13 : vector<512xf32> to vector<512x1xf32>
    %c0_9 = arith.constant 0 : index
    %15 = memref.load %arg5[%c0_9] : memref<1xf32, #tpu.memory_space<smem>>
    %16 = vector.broadcast %15 : f32 to vector<512x1xf32>
    %17 = arith.addf %14, %16 : vector<512x1xf32>
    %c0_10 = arith.constant 0 : index
    %c0_11 = arith.constant 0 : index
    %18 = vector.load %arg6[%c0_10, %c0_11] : memref<512x1xf32, #tpu.memory_space<vmem>>, vector<512x1xf32>
    tpu.vector_store %arg6[%c0_10, %c0_11], %17 {strides = array<i32>} : memref<512x1xf32, #tpu.memory_space<vmem>>, vector<512x1xf32>,
    return
  }
  func.func @transform_0(%arg0: i32) -> (i32, i32) {
    %c0_i32 = arith.constant 0 : i32
    %c0_i32_0 = arith.constant 0 : i32
    return %arg0, %c0_i32 : i32, i32
  }
  func.func @transform_1(%arg0: i32) -> (i32, i32) {
    %c0_i32 = arith.constant 0 : i32
    %c0_i32_0 = arith.constant 0 : i32
    %c0_i32_1 = arith.constant 0 : i32
    return %c0_i32, %c0_i32_0 : i32, i32
  }
  func.func @transform_2(%arg0: i32) -> (i32, i32) {
    %c0_i32 = arith.constant 0 : i32
    %c0_i32_0 = arith.constant 0 : i32
    %c0_i32_1 = arith.constant 0 : i32
    return %c0_i32, %c0_i32_0 : i32, i32
  }
  func.func @transform_3(%arg0: i32) -> (i32, i32) {
    %c0_i32 = arith.constant 0 : i32
    %c0_i32_0 = arith.constant 0 : i32
    %c0_i32_1 = arith.constant 0 : i32
    return %c0_i32, %c0_i32_0 : i32, i32
  }
  func.func @transform_4(%arg0: i32) -> i32 {
    %c0_i32 = arith.constant 0 : i32
    %c0_i32_0 = arith.constant 0 : i32
    return %c0_i32 : i32
  }
  func.func @transform_5(%arg0: i32) -> (i32, i32) {
    %c0_i32 = arith.constant 0 : i32
    %c0_i32_0 = arith.constant 0 : i32
    return %arg0, %c0_i32 : i32, i32
  }
}

</mosaic_0001>

<bundles_post_ra>
// kernel: tpu_custom_call.1
= control target key start
LH: loop header
LB: loop body
LE: loop exit
PB: predicated region body
PF: predicated region fallthrough
CT: control target
= control target key end

     0   :  { %s1149_s20 = smov 0   ;;  %s1617_s0 = inlined_call_operand.vmem [shape: f32[1024,32], index: 0, kind: input, shape index: {}]   ;;  %s1618_s1 = inlined_call_operand.vmem [shape: f32[32,128], index: 1, kind: input, shape index: {}]   ;;  %s1619_s2 = inlined_call_operand.vmem [shape: f32[1,128], index: 2, kind: input, shape index: {}]   ;;  %s1620_s3 = inlined_call_operand.vmem [shape: f32[1,128], index: 3, kind: input, shape index: {}]   ;;  %s1621_s4 = inlined_call_operand.<no memory space> [shape: f32[1], index: 4, kind: input, shape index: {}]   ;;  %s1622_s5 = inlined_call_operand.vmem [shape: f32[1024,1], index: 5, kind: output, shape index: {}]  }
   0x1   :  { %10 = sst [smem:[#allocation2]] %s1621_s4 }
   0x2 LB: > { %s1049_s21 = sadd.s32 4294967295, %s1114_s20   ;;  %p1053_p0 = scmp.ge.s32.totalorder %s1114_s20, 1  ;;  %s1114_s20 = sphi %s1149_s20, %s16_s20  }
   0x3   : > { %p189_p1 = scmp.lt.s32.totalorder %s1114_s20, 3 }
   0x5   : > { %p190_p2 = pnand %p1053_p0, %p189_p1 }
   0x6   : > { %s1054_s27 = sshll.u32 (!%p190_p2), %s1049_s21, 6  ;;  %s862_s13 = sld [smem:[#allocation2]] (!%p190_p2) }
   0x7   : > { %193 = sbr.rel (%p190_p2) target bundleno = 442 (0x1ba), region = 40  ;;  %p218_p3 = scmp.lt.s32.totalorder (!%p190_p2), %s1054_s27, 127 }
   0xc   : > { %v328_v0 = vld [vmem:[%s1618_s1 + $0x10] sm:$0xff]  ;;  %v329_v1 = vld [vmem:[%s1618_s1 + $0x18] sm:$0xff]  ;;  %v326_v2 = vld [vmem:[%s1618_s1] sm:$0xff]  ;;  %s1624_s27 = smov (!%p218_p3, %s1054_s27), 127  ;;  %vm336_vm0 = vcmask 261120   ;;  %vm928_vm1 = vcmask 7168  }
   0xd   : > { %v331_v3 = vpack.c.bf16 %v329_v1, %v328_v0  ;;  %v327_v4 = vld [vmem:[%s1618_s1 + $0x8] sm:$0xff]  ;;  %s1055_s30 = sshll.u32 %s1624_s27, 3 }
   0xe   : > { %v330_v5 = vpack.c.bf16 %v327_v4, %v326_v2  ;;  %s1177_s8 = scalar_lea.vmem %s1617_s0, %s1055_s30  ;;  %s1381_s16 = scalar_lea.vmem %s1622_s5, %s1055_s30 }
   0xf   : > { %439 = vmatpush.bf16.msra.mxu0 %v331_v3  ;;  %1092 = vmatpush.bf16.msra.mxu1 %v331_v3  ;;  %v230_v6 = vld [vmem:[%s1177_s8] sm:$0xff]  ;;  %v231_v7 = vld [vmem:[%s1177_s8 + $0x8] sm:$0xff]  ;;  %v232_v18 = vld [vmem:[%s1177_s8 + $0x10] sm:$0xff] }
  0x10   : > { %1093 = vmatpush.bf16.msra.mxu2 %v331_v3  ;;  %1094 = vmatpush.bf16.msra.mxu3 %v331_v3  ;;  %v246_v8 = vld [vmem:[%s1177_s8 + $0x80] sm:$0xff]  ;;  %v294_v9 = vpack.c.bf16 %v231_v7, %v230_v6  ;;  %v247_v10 = vld [vmem:[%s1177_s8 + $0x88] sm:$0xff]  ;;  %v233_v19 = vld [vmem:[%s1177_s8 + $0x18] sm:$0xff] }
  0x11   : > { %v262_v11 = vld [vmem:[%s1177_s8 + $0x100] sm:$0xff]  ;;  %v263_v12 = vld [vmem:[%s1177_s8 + $0x108] sm:$0xff]  ;;  %v302_v13 = vpack.c.bf16 %v247_v10, %v246_v8  ;;  %v264_v20 = vld [vmem:[%s1177_s8 + $0x110] sm:$0xff]  ;;  %v295_v26 = vpack.c.bf16 %v233_v19, %v232_v18 }
  0x12   : > { %v310_v14 = vpack.c.bf16 %v263_v12, %v262_v11  ;;  %v278_v15 = vld [vmem:[%s1177_s8 + $0x180] sm:$0xff]  ;;  %v279_v16 = vld [vmem:[%s1177_s8 + $0x188] sm:$0xff]  ;;  %v265_v21 = vld [vmem:[%s1177_s8 + $0x118] sm:$0xff] }
  0x13   : > { %440 = vmatpush.bf16.msra.mxu0 %v330_v5  ;;  %1095 = vmatpush.bf16.msra.mxu1 %v330_v5  ;;  %v318_v17 = vpack.c.bf16 %v279_v16, %v278_v15  ;;  %v248_v22 = vld [vmem:[%s1177_s8 + $0x90] sm:$0xff]  ;;  %v249_v23 = vld [vmem:[%s1177_s8 + $0x98] sm:$0xff]  ;;  %v311_v27 = vpack.c.bf16 %v265_v21, %v264_v20  ;;  %v234_v30 = vld [vmem:[%s1177_s8 + $0x20] sm:$0xff] }
  0x14   : > { %1096 = vmatpush.bf16.msra.mxu2 %v330_v5  ;;  %1097 = vmatpush.bf16.msra.mxu3 %v330_v5  ;;  %v280_v24 = vld [vmem:[%s1177_s8 + $0x190] sm:$0xff]  ;;  %v281_v25 = vld [vmem:[%s1177_s8 + $0x198] sm:$0xff]  ;;  %v303_v28 = vpack.c.bf16 %v249_v23, %v248_v22  ;;  %v235_v31 = vld [vmem:[%s1177_s8 + $0x28] sm:$0xff] }
  0x15   : > { %v319_v29 = vpack.c.bf16 %v281_v25, %v280_v24  ;;  %v266_v32 = vld [vmem:[%s1177_s8 + $0x120] sm:$0xff]  ;;  %v267_v33 = vld [vmem:[%s1177_s8 + $0x128] sm:$0xff]  ;;  %v296_v38 = vpack.c.bf16 %v235_v31, %v234_v30  ;;  %v236_v42 = vld [vmem:[%s1177_s8 + $0x30] sm:$0xff] }
  0x16   : > { %1058 = vmatmul.msk.bf16.vlgmr.msra.gmra.mxu0 %vm336_vm0, %v294_v9  ;;  %1066 = vmatmul.msk.bf16.vlgmr.msra.gmra.mxu1 %vm336_vm0, %v302_v13  ;;  %v250_v34 = vld [vmem:[%s1177_s8 + $0xa0] sm:$0xff]  ;;  %v251_v35 = vld [vmem:[%s1177_s8 + $0xa8] sm:$0xff]  ;;  %v312_v39 = vpack.c.bf16 %v267_v33, %v266_v32  ;;  %v237_v43 = vld [vmem:[%s1177_s8 + $0x38] sm:$0xff] }
  0x17   : > { %1074 = vmatmul.msk.bf16.vlgmr.msra.gmra.mxu2 %vm336_vm0, %v310_v14  ;;  %1082 = vmatmul.msk.bf16.vlgmr.msra.gmra.mxu3 %vm336_vm0, %v318_v17  ;;  %v282_v36 = vld [vmem:[%s1177_s8 + $0x1a0] sm:$0xff]  ;;  %v283_v37 = vld [vmem:[%s1177_s8 + $0x1a8] sm:$0xff]  ;;  %v304_v40 = vpack.c.bf16 %v251_v35, %v250_v34  ;;  %v268_v44 = vld [vmem:[%s1177_s8 + $0x130] sm:$0xff]  ;;  %v297_v50 = vpack.c.bf16 %v237_v43, %v236_v42 }
  0x18   : > { %v320_v41 = vpack.c.bf16 %v283_v37, %v282_v36  ;;  %v269_v45 = vld [vmem:[%s1177_s8 + $0x138] sm:$0xff]  ;;  %v252_v46 = vld [vmem:[%s1177_s8 + $0xb0] sm:$0xff]  ;;  %v238_v54 = vld [vmem:[%s1177_s8 + $0x40] sm:$0xff] }
  0x19   : > { %v253_v47 = vld [vmem:[%s1177_s8 + $0xb8] sm:$0xff]  ;;  %v284_v48 = vld [vmem:[%s1177_s8 + $0x1b0] sm:$0xff]  ;;  %v313_v51 = vpack.c.bf16 %v269_v45, %v268_v44  ;;  %v239_v55 = vld [vmem:[%s1177_s8 + $0x48] sm:$0xff] }
  0x1a   : > { %v285_v49 = vld [vmem:[%s1177_s8 + $0x1b8] sm:$0xff]  ;;  %v305_v52 = vpack.c.bf16 %v253_v47, %v252_v46  ;;  %v254_v56 = vld [vmem:[%s1177_s8 + $0xc0] sm:$0xff]  ;;  %v255_v57 = vld [vmem:[%s1177_s8 + $0xc8] sm:$0xff]  ;;  %v298_v62 = vpack.c.bf16 %v239_v55, %v238_v54 }
  0x1b   : > { %v321_v53 = vpack.c.bf16 %v285_v49, %v284_v48  ;;  %v270_v58 = vld [vmem:[%s1177_s8 + $0x140] sm:$0xff]  ;;  %v271_v59 = vld [vmem:[%s1177_s8 + $0x148] sm:$0xff]  ;;  %v306_v63 = vpack.c.bf16 %v255_v57, %v254_v56  ;;  %v272_v2 = vld [vmem:[%s1177_s8 + $0x150] sm:$0xff] }
  0x1c   : > { %v286_v60 = vld [vmem:[%s1177_s8 + $0x1c0] sm:$0xff]  ;;  %v287_v61 = vld [vmem:[%s1177_s8 + $0x1c8] sm:$0xff]  ;;  %v314_v0 = vpack.c.bf16 %v271_v59, %v270_v58  ;;  %v240_v3 = vld [vmem:[%s1177_s8 + $0x50] sm:$0xff] }
  0x1d   : > { %v322_v1 = vpack.c.bf16 %v287_v61, %v286_v60  ;;  %v241_v4 = vld [vmem:[%s1177_s8 + $0x58] sm:$0xff]  ;;  %v256_v6 = vld [vmem:[%s1177_s8 + $0xd0] sm:$0xff]  ;;  %v242_v14 = vld [vmem:[%s1177_s8 + $0x60] sm:$0xff] }
  0x1e   : > { %v273_v5 = vld [vmem:[%s1177_s8 + $0x158] sm:$0xff]  ;;  %v288_v8 = vld [vmem:[%s1177_s8 + $0x1d0] sm:$0xff]  ;;  %v299_v10 = vpack.c.bf16 %v241_v4, %v240_v3  ;;  %v243_v15 = vld [vmem:[%s1177_s8 + $0x68] sm:$0xff] }
  0x1f   : > { %v257_v7 = vld [vmem:[%s1177_s8 + $0xd8] sm:$0xff]  ;;  %v315_v11 = vpack.c.bf16 %v273_v5, %v272_v2  ;;  %v274_v16 = vld [vmem:[%s1177_s8 + $0x160] sm:$0xff]  ;;  %v275_v17 = vld [vmem:[%s1177_s8 + $0x168] sm:$0xff]  ;;  %v300_v20 = vpack.c.bf16 %v243_v15, %v242_v14 }
  0x20   : > { %v289_v9 = vld [vmem:[%s1177_s8 + $0x1d8] sm:$0xff]  ;;  %v307_v12 = vpack.c.bf16 %v257_v7, %v256_v6  ;;  %v290_v18 = vld [vmem:[%s1177_s8 + $0x1e0] sm:$0xff]  ;;  %v291_v19 = vld [vmem:[%s1177_s8 + $0x1e8] sm:$0xff]  ;;  %v316_v21 = vpack.c.bf16 %v275_v17, %v274_v16 }
  0x21   : > { %v323_v13 = vpack.c.bf16 %v289_v9, %v288_v8  ;;  %v324_v22 = vpack.c.bf16 %v291_v19, %v290_v18  ;;  %v258_v23 = vld [vmem:[%s1177_s8 + $0xe0] sm:$0xff]  ;;  %v259_v24 = vld [vmem:[%s1177_s8 + $0xe8] sm:$0xff]  ;;  %v245_v30 = vld [vmem:[%s1177_s8 + $0x78] sm:$0xff] }
  0x22   : > { %v308_v25 = vpack.c.bf16 %v259_v24, %v258_v23  ;;  %v260_v31 = vld [vmem:[%s1177_s8 + $0xf0] sm:$0xff]  ;;  %v261_v33 = vld [vmem:[%s1177_s8 + $0xf8] sm:$0xff]  ;;  %v1284_v42 = vld [vmem:[%s1620_s3] ss:$0 sm:$0xff] }
  0x23   : > { %v292_v34 = vld [vmem:[%s1177_s8 + $0x1f0] sm:$0xff]  ;;  %v293_v35 = vld [vmem:[%s1177_s8 + $0x1f8] sm:$0xff]  ;;  %v309_v36 = vpack.c.bf16 %v261_v33, %v260_v31 }
  0x24   : > { %v325_v37 = vpack.c.bf16 %v293_v35, %v292_v34 }
  0x26   : > { %1059 = vmatmul.msk.bf16.gmra.mxu0 %vm336_vm0, %v295_v26  ;;  %1067 = vmatmul.msk.bf16.gmra.mxu1 %vm336_vm0, %v303_v28  ;;  %v276_v26 = vld [vmem:[%s1177_s8 + $0x170] sm:$0xff] }
  0x27   : > { %1075 = vmatmul.msk.bf16.gmra.mxu2 %vm336_vm0, %v311_v27  ;;  %1083 = vmatmul.msk.bf16.gmra.mxu3 %vm336_vm0, %v319_v29  ;;  %v277_v27 = vld [vmem:[%s1177_s8 + $0x178] sm:$0xff]  ;;  %v244_v29 = vld [vmem:[%s1177_s8 + $0x70] sm:$0xff] }
  0x28   : > { %v317_v28 = vpack.c.bf16 %v277_v27, %v276_v26  ;;  %v301_v32 = vpack.c.bf16 %v245_v30, %v244_v29 }
  0x36   : > { %1060 = vmatmul.msk.bf16.gmra.mxu0 %vm336_vm0, %v296_v38  ;;  %1068 = vmatmul.msk.bf16.gmra.mxu1 %vm336_vm0, %v304_v40  ;;  %v1278_v38 = vld [vmem:[%s1619_s2] ss:$0 sm:$0xff] }
  0x37   : > { %1076 = vmatmul.msk.bf16.gmra.mxu2 %vm336_vm0, %v312_v39  ;;  %1084 = vmatmul.msk.bf16.gmra.mxu3 %vm336_vm0, %v320_v41 }
  0x46   : > { %1061 = vmatmul.msk.bf16.gmra.mxu0 %vm336_vm0, %v297_v50  ;;  %1069 = vmatmul.msk.bf16.gmra.mxu1 %vm336_vm0, %v305_v52 }
  0x47   : > { %1077 = vmatmul.msk.bf16.gmra.mxu2 %vm336_vm0, %v313_v51  ;;  %1085 = vmatmul.msk.bf16.gmra.mxu3 %vm336_vm0, %v321_v53 }
  0x56   : > { %1062 = vmatmul.msk.bf16.gmra.mxu0 %vm336_vm0, %v298_v62  ;;  %1070 = vmatmul.msk.bf16.gmra.mxu1 %vm336_vm0, %v306_v63 }
  0x57   : > { %1078 = vmatmul.msk.bf16.gmra.mxu2 %vm336_vm0, %v314_v0  ;;  %1086 = vmatmul.msk.bf16.gmra.mxu3 %vm336_vm0, %v322_v1 }
  0x66   : > { %1063 = vmatmul.msk.bf16.gmra.mxu0 %vm336_vm0, %v299_v10  ;;  %1071 = vmatmul.msk.bf16.gmra.mxu1 %vm336_vm0, %v307_v12 }
  0x67   : > { %1079 = vmatmul.msk.bf16.gmra.mxu2 %vm336_vm0, %v315_v11  ;;  %1087 = vmatmul.msk.bf16.gmra.mxu3 %vm336_vm0, %v323_v13 }
  0x76   : > { %1064 = vmatmul.msk.bf16.gmra.mxu0 %vm336_vm0, %v300_v20  ;;  %1072 = vmatmul.msk.bf16.gmra.mxu1 %vm336_vm0, %v308_v25 }
  0x77   : > { %1080 = vmatmul.msk.bf16.gmra.mxu2 %vm336_vm0, %v316_v21  ;;  %1088 = vmatmul.msk.bf16.gmra.mxu3 %vm336_vm0, %v324_v22 }
  0x86   : > { %1065 = vmatmul.msk.bf16.gmra.mxu0 %vm336_vm0, %v301_v32  ;;  %1073 = vmatmul.msk.bf16.gmra.mxu1 %vm336_vm0, %v309_v36 }
  0x87   : > { %1081 = vmatmul.msk.bf16.gmra.mxu2 %vm336_vm0, %v317_v28  ;;  %1089 = vmatmul.msk.bf16.gmra.mxu3 %vm336_vm0, %v325_v37 }
  0x93   : > { %v442_v39 = vpop.f32.mrf.mxu0  ;;  %v482_v41 = vpop.f32.mrf.mxu1 }
  0x94   : > { %v443_v40 = vadd.f32 %v1278_v38, %v442_v39  ;;  %v483_v43 = vadd.f32 %v1278_v38, %v482_v41 }
  0x96   : > { %v602_v44 = vmax.f32 %v443_v40, 0.0  ;;  %v618_v45 = vmax.f32 %v483_v43, 0.0 }
  0x98   : > { %v670_v46 = vmul.f32 %v1284_v42, %v602_v44  ;;  %v686_v47 = vmul.f32 %v1284_v42, %v618_v45 }
  0x9a   : > { %v522_v48 = vpop.f32.mrf.mxu2  ;;  %734 = vadd.xlane.f32.xlu0 %v670_v46  ;;  %v562_v50 = vpop.f32.mrf.mxu3  ;;  %766 = vadd.xlane.f32.xlu1 %v686_v47 }
  0x9b   : > { %v523_v49 = vadd.f32 %v1278_v38, %v522_v48  ;;  %v444_v51 = vpop.f32.mrf.mxu0  ;;  %v563_v52 = vadd.f32 %v1278_v38, %v562_v50  ;;  %v484_v53 = vpop.f32.mrf.mxu1 }
  0x9c   : > { %v485_v56 = vadd.f32 %v1278_v38, %v484_v53  ;;  %v445_v58 = vadd.f32 %v1278_v38, %v444_v51 }
  0x9d   : > { %v634_v54 = vmax.f32 %v523_v49, 0.0  ;;  %v650_v55 = vmax.f32 %v563_v52, 0.0 }
  0x9e   : > { %v619_v61 = vmax.f32 %v485_v56, 0.0  ;;  %v603_v0 = vmax.f32 %v445_v58, 0.0 }
  0x9f   : > { %v702_v57 = vmul.f32 %v1284_v42, %v634_v54  ;;  %v718_v59 = vmul.f32 %v1284_v42, %v650_v55 }
  0xa0   : > { %v687_v4 = vmul.f32 %v1284_v42, %v619_v61  ;;  %v671_v6 = vmul.f32 %v1284_v42, %v603_v0 }
  0xa1   : > { %798 = vadd.xlane.f32.xlu2 %v702_v57 }
  0xa2   : > { %v524_v60 = vpop.f32.mrf.mxu2  ;;  %830 = vadd.xlane.f32.xlu0 %v718_v59  ;;  %v564_v62 = vpop.f32.mrf.mxu3 }
  0xa3   : > { %v447_v63 = vpop.f32.mrf.mxu0  ;;  %v565_v1 = vadd.f32 %v1278_v38, %v564_v62  ;;  %v487_v7 = vpop.f32.mrf.mxu1  ;;  %v525_v8 = vadd.f32 %v1278_v38, %v524_v60 }
  0xa4   : > { %v448_v3 = vadd.f32 %v1278_v38, %v447_v63  ;;  %v488_v17 = vadd.f32 %v1278_v38, %v487_v7 }
  0xa5   : > { %v651_v2 = vmax.f32 %v565_v1, 0.0  ;;  %v635_v14 = vmax.f32 %v525_v8, 0.0 }
  0xa6   : > { %v604_v9 = vmax.f32 %v448_v3, 0.0  ;;  %v620_v23 = vmax.f32 %v488_v17, 0.0 }
  0xa7   : > { %v719_v5 = vmul.f32 %v1284_v42, %v651_v2  ;;  %v703_v20 = vmul.f32 %v1284_v42, %v635_v14 }
  0xa8   : > { %v672_v16 = vmul.f32 %v1284_v42, %v604_v9  ;;  %v688_v31 = vmul.f32 %v1284_v42, %v620_v23 }
  0xa9   : > { %768 = vadd.xlane.f32.xlu2 %v687_v4  ;;  %832 = vadd.xlane.f32.xlu1 %v719_v5 }
  0xaa   : > { %v527_v10 = vpop.f32.mrf.mxu2  ;;  %736 = vadd.xlane.f32.xlu0 %v671_v6  ;;  %v567_v11 = vpop.f32.mrf.mxu3 }
  0xab   : > { %v449_v12 = vpop.f32.mrf.mxu0  ;;  %v568_v13 = vadd.f32 %v1278_v38, %v567_v11  ;;  %v528_v18 = vadd.f32 %v1278_v38, %v527_v10  ;;  %v489_v22 = vpop.f32.mrf.mxu1 }
  0xac   : > { %v450_v32 = vadd.f32 %v1278_v38, %v449_v12  ;;  %v490_v45 = vadd.f32 %v1278_v38, %v489_v22 }
  0xad   : > { %v652_v15 = vmax.f32 %v568_v13, 0.0  ;;  %v636_v25 = vmax.f32 %v528_v18, 0.0 }
  0xae   : > { %v605_v36 = vmax.f32 %v450_v32, 0.0  ;;  %v621_v51 = vmax.f32 %v490_v45, 0.0 }
  0xaf   : > { %v720_v19 = vmul.f32 %v1284_v42, %v652_v15  ;;  %v704_v33 = vmul.f32 %v1284_v42, %v636_v25 }
  0xb0   : > { %v673_v46 = vmul.f32 %v1284_v42, %v605_v36  ;;  %v689_v58 = vmul.f32 %v1284_v42, %v621_v51 }
  0xb1   : > { %834 = vadd.xlane.f32.xlu2 %v720_v19  ;;  %738 = vadd.xlane.f32.xlu1 %v672_v16 }
  0xb2   : > { %v529_v21 = vpop.f32.mrf.mxu2  ;;  %800 = vadd.xlane.f32.xlu0 %v703_v20  ;;  %v569_v28 = vpop.f32.mrf.mxu3 }
  0xb3   : > { %v530_v24 = vadd.f32 %v1278_v38, %v529_v21  ;;  %v452_v27 = vpop.f32.mrf.mxu0  ;;  %v570_v34 = vadd.f32 %v1278_v38, %v569_v28  ;;  %v492_v37 = vpop.f32.mrf.mxu1 }
  0xb4   : > { %v453_v29 = vadd.f32 %v1278_v38, %v452_v27  ;;  %v493_v40 = vadd.f32 %v1278_v38, %v492_v37 }
  0xb5   : > { %v637_v26 = vmax.f32 %v530_v24, 0.0  ;;  %v653_v39 = vmax.f32 %v570_v34, 0.0 }
  0xb6   : > { %v606_v35 = vmax.f32 %v453_v29, 0.0  ;;  %v622_v48 = vmax.f32 %v493_v40, 0.0 }
  0xb7   : > { %v705_v30 = vmul.f32 %v1284_v42, %v637_v26  ;;  %v721_v47 = vmul.f32 %v1284_v42, %v653_v39 }
  0xb8   : > { %v674_v43 = vmul.f32 %v1284_v42, %v606_v35  ;;  %v690_v55 = vmul.f32 %v1284_v42, %v622_v48 }
  0xb9   : > { %804 = vadd.xlane.f32.xlu2 %v705_v30  ;;  %802 = vadd.xlane.f32.xlu1 %v704_v33 }
  0xba   : > { %770 = vadd.xlane.f32.xlu0 %v688_v31  ;;  %v532_v41 = vpop.f32.mrf.mxu2  ;;  %v572_v49 = vpop.f32.mrf.mxu3 }
  0xbb   : > { %v533_v44 = vadd.f32 %v1278_v38, %v532_v41  ;;  %v454_v52 = vpop.f32.mrf.mxu0  ;;  %v494_v53 = vpop.f32.mrf.mxu1  ;;  %v573_v54 = vadd.f32 %v1278_v38, %v572_v49 }
  0xbc   : > { %v455_v57 = vadd.f32 %v1278_v38, %v454_v52  ;;  %v495_v59 = vadd.f32 %v1278_v38, %v494_v53 }
  0xbd   : > { %v638_v50 = vmax.f32 %v533_v44, 0.0  ;;  %v654_v60 = vmax.f32 %v573_v54, 0.0 }
  0xbe   : > { %v607_v61 = vmax.f32 %v455_v57, 0.0  ;;  %v623_v0 = vmax.f32 %v495_v59, 0.0 }
  0xbf   : > { %v706_v56 = vmul.f32 %v1284_v42, %v638_v50  ;;  %v722_v2 = vmul.f32 %v1284_v42, %v654_v60 }
  0xc0   : > { %v675_v6 = vmul.f32 %v1284_v42, %v607_v61  ;;  %v691_v7 = vmul.f32 %v1284_v42, %v623_v0 }
  0xc1   : > { %742 = vadd.xlane.f32.xlu2 %v674_v43  ;;  %740 = vadd.xlane.f32.xlu1 %v673_v46 }
  0xc2   : > { %836 = vadd.xlane.f32.xlu0 %v721_v47  ;;  %v534_v62 = vpop.f32.mrf.mxu2  ;;  %v574_v63 = vpop.f32.mrf.mxu3 }
  0xc3   : > { %v457_v1 = vpop.f32.mrf.mxu0  ;;  %v535_v4 = vadd.f32 %v1278_v38, %v534_v62  ;;  %v575_v5 = vadd.f32 %v1278_v38, %v574_v63  ;;  %v497_v8 = vpop.f32.mrf.mxu1 }
  0xc4   : > { %v458_v3 = vadd.f32 %v1278_v38, %v457_v1  ;;  %v498_v13 = vadd.f32 %v1278_v38, %v497_v8 }
  0xc5   : > { %v639_v10 = vmax.f32 %v535_v4, 0.0  ;;  %v655_v11 = vmax.f32 %v575_v5, 0.0 }
  0xc6   : > { %v608_v9 = vmax.f32 %v458_v3, 0.0  ;;  %v624_v20 = vmax.f32 %v498_v13, 0.0 }
  0xc7   : > { %v723_v18 = vmul.f32 %v1284_v42, %v655_v11  ;;  %v707_v19 = vmul.f32 %v1284_v42, %v639_v10 }
  0xc8   : > { %v676_v17 = vmul.f32 %v1284_v42, %v608_v9  ;;  %v692_v27 = vmul.f32 %v1284_v42, %v624_v20 }
  0xc9   : > { %774 = vadd.xlane.f32.xlu2 %v690_v55  ;;  %772 = vadd.xlane.f32.xlu1 %v689_v58 }
  0xca   : > { %806 = vadd.xlane.f32.xlu0 %v706_v56  ;;  %v537_v12 = vpop.f32.mrf.mxu2  ;;  %v577_v15 = vpop.f32.mrf.mxu3 }
  0xcb   : > { %v538_v14 = vadd.f32 %v1278_v38, %v537_v12  ;;  %v578_v16 = vadd.f32 %v1278_v38, %v577_v15  ;;  %v459_v23 = vpop.f32.mrf.mxu0  ;;  %v499_v24 = vpop.f32.mrf.mxu1 }
  0xcc   : > { %v460_v29 = vadd.f32 %v1278_v38, %v459_v23  ;;  %v500_v30 = vadd.f32 %v1278_v38, %v499_v24 }
  0xcd   : > { %v640_v21 = vmax.f32 %v538_v14, 0.0  ;;  %v656_v22 = vmax.f32 %v578_v16, 0.0 }
  0xce   : > { %v609_v32 = vmax.f32 %v460_v29, 0.0  ;;  %v625_v33 = vmax.f32 %v500_v30, 0.0 }
  0xcf   : > { %v708_v26 = vmul.f32 %v1284_v42, %v640_v21  ;;  %v724_v28 = vmul.f32 %v1284_v42, %v656_v22 }
  0xd0   : > { %v693_v43 = vmul.f32 %v1284_v42, %v625_v33  ;;  %v677_v44 = vmul.f32 %v1284_v42, %v609_v32  ;;  %v1374_v32 = vstv %s862_s13 }
  0xd1   : > { %744 = vadd.xlane.f32.xlu2 %v675_v6  ;;  %838 = vadd.xlane.f32.xlu1 %v722_v2 }
  0xd2   : > { %776 = vadd.xlane.f32.xlu0 %v691_v7  ;;  %v539_v25 = vpop.f32.mrf.mxu2  ;;  %v579_v34 = vpop.f32.mrf.mxu3 }
  0xd3   : > { %v540_v31 = vadd.f32 %v1278_v38, %v539_v25  ;;  %v462_v35 = vpop.f32.mrf.mxu0  ;;  %v502_v39 = vpop.f32.mrf.mxu1  ;;  %v580_v41 = vadd.f32 %v1278_v38, %v579_v34 }
  0xd4   : > { %v463_v37 = vadd.f32 %v1278_v38, %v462_v35  ;;  %v503_v40 = vadd.f32 %v1278_v38, %v502_v39 }
  0xd5   : > { %v641_v36 = vmax.f32 %v540_v31, 0.0  ;;  %v657_v49 = vmax.f32 %v580_v41, 0.0 }
  0xd6   : > { %v610_v47 = vmax.f32 %v463_v37, 0.0  ;;  %v626_v48 = vmax.f32 %v503_v40, 0.0 }
  0xd7   : > { %v709_v46 = vmul.f32 %v1284_v42, %v641_v36  ;;  %v725_v56 = vmul.f32 %v1284_v42, %v657_v49 }
  0xd8   : > { %v678_v54 = vmul.f32 %v1284_v42, %v610_v47  ;;  %v694_v55 = vmul.f32 %v1284_v42, %v626_v48 }
  0xd9   : > { %840 = vadd.xlane.f32.xlu2 %v723_v18  ;;  %808 = vadd.xlane.f32.xlu1 %v707_v19 }
  0xda   : > { %746 = vadd.xlane.f32.xlu0 %v676_v17  ;;  %v542_v45 = vpop.f32.mrf.mxu2  ;;  %v582_v50 = vpop.f32.mrf.mxu3 }
  0xdb   : > { %v464_v51 = vpop.f32.mrf.mxu0  ;;  %v543_v52 = vadd.f32 %v1278_v38, %v542_v45  ;;  %v583_v53 = vadd.f32 %v1278_v38, %v582_v50  ;;  %v504_v61 = vpop.f32.mrf.mxu1 }
  0xdc   : > { %v465_v57 = vadd.f32 %v1278_v38, %v464_v51  ;;  %v505_v2 = vadd.f32 %v1278_v38, %v504_v61 }
  0xdd   : > { %v642_v58 = vmax.f32 %v543_v52, 0.0  ;;  %v658_v59 = vmax.f32 %v583_v53, 0.0 }
  0xde   : > { %v611_v62 = vmax.f32 %v465_v57, 0.0  ;;  %v627_v8 = vmax.f32 %v505_v2, 0.0 }
  0xdf   : > { %v726_v0 = vmul.f32 %v1284_v42, %v658_v59  ;;  %v710_v1 = vmul.f32 %v1284_v42, %v642_v58 }
  0xe0   : > { %v679_v6 = vmul.f32 %v1284_v42, %v611_v62  ;;  %v695_v16 = vmul.f32 %v1284_v42, %v627_v8 }
  0xe1   : > { %810 = vadd.xlane.f32.xlu2 %v708_v26  ;;  %778 = vadd.xlane.f32.xlu1 %v692_v27 }
  0xe2   : > { %842 = vadd.xlane.f32.xlu0 %v724_v28  ;;  %v544_v60 = vpop.f32.mrf.mxu2  ;;  %v584_v63 = vpop.f32.mrf.mxu3 }
  0xe3   : > { %v545_v3 = vadd.f32 %v1278_v38, %v544_v60  ;;  %v467_v4 = vpop.f32.mrf.mxu0  ;;  %v585_v5 = vadd.f32 %v1278_v38, %v584_v63  ;;  %v507_v7 = vpop.f32.mrf.mxu1 }
  0xe4   : > { %v468_v12 = vadd.f32 %v1278_v38, %v467_v4  ;;  %v508_v13 = vadd.f32 %v1278_v38, %v507_v7 }
  0xe5   : > { %v643_v9 = vmax.f32 %v545_v3, 0.0  ;;  %v659_v11 = vmax.f32 %v585_v5, 0.0 }
  0xe6   : > { %v612_v18 = vmax.f32 %v468_v12, 0.0  ;;  %v628_v19 = vmax.f32 %v508_v13, 0.0 }
  0xe7   : > { %v711_v15 = vmul.f32 %v1284_v42, %v643_v9  ;;  %v727_v17 = vmul.f32 %v1284_v42, %v659_v11 }
  0xe8   : > { %v696_v26 = vmul.f32 %v1284_v42, %v628_v19  ;;  %v680_v27 = vmul.f32 %v1284_v42, %v612_v18 }
  0xe9   : > { %780 = vadd.xlane.f32.xlu2 %v693_v43  ;;  %748 = vadd.xlane.f32.xlu1 %v677_v44 }
  0xea   : > { %812 = vadd.xlane.f32.xlu0 %v709_v46  ;;  %v547_v10 = vpop.f32.mrf.mxu2  ;;  %v587_v21 = vpop.f32.mrf.mxu3 }
  0xeb   : > { %v548_v14 = vadd.f32 %v1278_v38, %v547_v10  ;;  %v469_v20 = vpop.f32.mrf.mxu0  ;;  %v509_v23 = vpop.f32.mrf.mxu1  ;;  %v588_v25 = vadd.f32 %v1278_v38, %v587_v21 }
  0xec   : > { %v470_v29 = vadd.f32 %v1278_v38, %v469_v20  ;;  %v510_v30 = vadd.f32 %v1278_v38, %v509_v23 }
  0xed   : > { %v644_v22 = vmax.f32 %v548_v14, 0.0  ;;  %v660_v31 = vmax.f32 %v588_v25, 0.0 }
  0xee   : > { %v613_v33 = vmax.f32 %v470_v29, 0.0  ;;  %v629_v36 = vmax.f32 %v510_v30, 0.0 }
  0xef   : > { %v712_v28 = vmul.f32 %v1284_v42, %v644_v22  ;;  %v728_v41 = vmul.f32 %v1284_v42, %v660_v31 }
  0xf0   : > { %v681_v49 = vmul.f32 %v1284_v42, %v613_v33  ;;  %v697_v50 = vmul.f32 %v1284_v42, %v629_v36 }
  0xf1   : > { %750 = vadd.xlane.f32.xlu2 %v678_v54  ;;  %844 = vadd.xlane.f32.xlu1 %v725_v56 }
  0xf2   : > { %782 = vadd.xlane.f32.xlu0 %v694_v55  ;;  %v549_v24 = vpop.f32.mrf.mxu2  ;;  %v589_v35 = vpop.f32.mrf.mxu3 }
  0xf3   : > { %v472_v34 = vpop.f32.mrf.mxu0  ;;  %v512_v39 = vpop.f32.mrf.mxu1  ;;  %v550_v47 = vadd.f32 %v1278_v38, %v549_v24  ;;  %v590_v48 = vadd.f32 %v1278_v38, %v589_v35 }
  0xf4   : > { %v473_v45 = vadd.f32 %v1278_v38, %v472_v34  ;;  %v513_v59 = vadd.f32 %v1278_v38, %v512_v39 }
  0xf5   : > { %v645_v52 = vmax.f32 %v550_v47, 0.0  ;;  %v661_v53 = vmax.f32 %v590_v48, 0.0 }
  0xf6   : > { %v614_v51 = vmax.f32 %v473_v45, 0.0  ;;  %v630_v4 = vmax.f32 %v513_v59, 0.0 }
  0xf7   : > { %v729_v63 = vmul.f32 %v1284_v42, %v661_v53 }
  0xf8   : > { %v682_v62 = vmul.f32 %v1284_v42, %v614_v51  ;;  %v698_v14 = vmul.f32 %v1284_v42, %v630_v4 }
  0xf9   : > { %846 = vadd.xlane.f32.xlu2 %v726_v0  ;;  %814 = vadd.xlane.f32.xlu1 %v710_v1  ;;  %v713_v0 = vmul.f32 %v1284_v42, %v645_v52 }
  0xfa   : > { %752 = vadd.xlane.f32.xlu0 %v679_v6  ;;  %v552_v43 = vpop.f32.mrf.mxu2  ;;  %v592_v58 = vpop.f32.mrf.mxu3 }
  0xfb   : > { %v553_v57 = vadd.f32 %v1278_v38, %v552_v43  ;;  %v593_v61 = vadd.f32 %v1278_v38, %v592_v58  ;;  %v514_v1 = vpop.f32.mrf.mxu1  ;;  %v474_v6 = vpop.f32.mrf.mxu0 }
  0xfd   : > { %v646_v3 = vmax.f32 %v553_v57, 0.0  ;;  %v662_v5 = vmax.f32 %v593_v61, 0.0 }
  0xff   : > { %v714_v13 = vmul.f32 %v1284_v42, %v646_v3 }
 0x101   : > { %816 = vadd.xlane.f32.xlu2 %v711_v15  ;;  %784 = vadd.xlane.f32.xlu1 %v695_v16  ;;  %v730_v15 = vmul.f32 %v1284_v42, %v662_v5  ;;  %v475_v16 = vadd.f32 %v1278_v38, %v474_v6 }
 0x102   : > { %848 = vadd.xlane.f32.xlu0 %v727_v17  ;;  %v554_v2 = vpop.f32.mrf.mxu2  ;;  %v515_v17 = vadd.f32 %v1278_v38, %v514_v1  ;;  %v594_v21 = vpop.f32.mrf.mxu3 }
 0x103   : > { %v555_v18 = vadd.f32 %v1278_v38, %v554_v2  ;;  %v517_v19 = vpop.f32.mrf.mxu1  ;;  %v615_v22 = vmax.f32 %v475_v16, 0.0  ;;  %v477_v24 = vpop.f32.mrf.mxu0  ;;  %v595_v6 = vadd.f32 %v1278_v38, %v594_v21 }
 0x104   : > { %v631_v23 = vmax.f32 %v515_v17, 0.0  ;;  %v478_v30 = vadd.f32 %v1278_v38, %v477_v24  ;;  %v518_v34 = vadd.f32 %v1278_v38, %v517_v19 }
 0x105   : > { %v647_v25 = vmax.f32 %v555_v18, 0.0 }
 0x106   : > { %v699_v36 = vmul.f32 %v1284_v42, %v631_v23  ;;  %v632_v43 = vmax.f32 %v518_v34, 0.0 }
 0x107   : > { %v715_v39 = vmul.f32 %v1284_v42, %v647_v25 }
 0x109   : > { %786 = vadd.xlane.f32.xlu2 %v696_v26  ;;  %754 = vadd.xlane.f32.xlu1 %v680_v27 }
 0x10a   : > { %818 = vadd.xlane.f32.xlu0 %v712_v28  ;;  %v557_v20 = vpop.f32.mrf.mxu2 }
 0x10b   : > { %v558_v28 = vadd.f32 %v1278_v38, %v557_v20  ;;  %v519_v45 = vpop.f32.mrf.mxu1 }
 0x10c   : > { %v520_v57 = vadd.f32 %v1278_v38, %v519_v45 }
 0x10d   : > { %v735_v37 = vpop.xlane.xlu0 %734  ;;  %v767_v44 = vpop.xlane.xlu1 %766 }
 0x10e   : > { %v864_v40 = vadd.f32 %v1374_v32, %v735_v37  ;;  %v880_v46 = vadd.f32 %v1374_v32, %v767_v44  ;;  %v683_v37 = vmul.f32 %v1284_v42, %v615_v22  ;;  %v597_v44 = vpop.f32.mrf.mxu3 }
 0x110   : > { %929 = vst.msk [vmem:[%s1381_s16] sm:$0xff] %vm928_vm1, %v864_v40  ;;  %v648_v40 = vmax.f32 %v558_v28, 0.0 }
 0x111   : > { %945 = vst.msk [vmem:[%s1381_s16 + $0x80] sm:$0xff] %vm928_vm1, %v880_v46  ;;  %756 = vadd.xlane.f32.xlu2 %v681_v49  ;;  %850 = vadd.xlane.f32.xlu1 %v728_v41  ;;  %v616_v41 = vmax.f32 %v478_v30, 0.0 }
 0x112   : > { %788 = vadd.xlane.f32.xlu0 %v697_v50  ;;  %v559_v46 = vpop.f32.mrf.mxu2  ;;  %v479_v50 = vpop.f32.mrf.mxu0 }
 0x113   : > { %v684_v53 = vmul.f32 %v1284_v42, %v616_v41  ;;  %v560_v58 = vadd.f32 %v1278_v38, %v559_v46  ;;  %v480_v59 = vadd.f32 %v1278_v38, %v479_v50 }
 0x114   : > { %v799_v54 = vpop.xlane.xlu2 %798 }
 0x115   : > { %v896_v55 = vadd.f32 %v1374_v32, %v799_v54  ;;  %v831_v56 = vpop.xlane.xlu0 %830  ;;  %v716_v54 = vmul.f32 %v1284_v42, %v648_v40  ;;  %v649_v61 = vmax.f32 %v560_v58, 0.0 }
 0x116   : > { %v912_v60 = vadd.f32 %v1374_v32, %v831_v56  ;;  %v700_v56 = vmul.f32 %v1284_v42, %v632_v43  ;;  %v599_v1 = vpop.f32.mrf.mxu3 }
 0x117   : > { %961 = vst.msk [vmem:[%s1381_s16 + $0x100] sm:$0xff] %vm928_vm1, %v896_v55 }
 0x118   : > { %977 = vst.msk [vmem:[%s1381_s16 + $0x180] sm:$0xff] %vm928_vm1, %v912_v60  ;;  %v633_v60 = vmax.f32 %v520_v57, 0.0 }
 0x119   : > { %852 = vadd.xlane.f32.xlu2 %v729_v63  ;;  %820 = vadd.xlane.f32.xlu1 %v713_v0 }
 0x11a   : > { %758 = vadd.xlane.f32.xlu0 %v682_v62  ;;  %v617_v62 = vmax.f32 %v480_v59, 0.0 }
 0x11c   : > { %v769_v7 = vpop.xlane.xlu2 %768  ;;  %v833_v9 = vpop.xlane.xlu1 %832 }
 0x11d   : > { %v881_v8 = vadd.f32 %v1374_v32, %v769_v7  ;;  %v737_v10 = vpop.xlane.xlu0 %736  ;;  %v913_v11 = vadd.f32 %v1374_v32, %v833_v9  ;;  %v598_v7 = vadd.f32 %v1278_v38, %v597_v44  ;;  %v701_v9 = vmul.f32 %v1284_v42, %v633_v60 }
 0x11e   : > { %v865_v12 = vadd.f32 %v1374_v32, %v737_v10  ;;  %v600_v10 = vadd.f32 %v1278_v38, %v599_v1 }
 0x11f   : > { %946 = vst.msk [vmem:[%s1381_s16 + $0x88] sm:$0xff] %vm928_vm1, %v881_v8  ;;  %v717_v8 = vmul.f32 %v1284_v42, %v649_v61 }
 0x120   : > { %978 = vst.msk [vmem:[%s1381_s16 + $0x188] sm:$0xff] %vm928_vm1, %v913_v11  ;;  %v685_v11 = vmul.f32 %v1284_v42, %v617_v62 }
 0x121   : > { %930 = vst.msk [vmem:[%s1381_s16 + $0x8] sm:$0xff] %vm928_vm1, %v865_v12  ;;  %822 = vadd.xlane.f32.xlu2 %v714_v13  ;;  %790 = vadd.xlane.f32.xlu1 %v698_v14  ;;  %v663_v12 = vmax.f32 %v595_v6, 0.0  ;;  %v664_v13 = vmax.f32 %v598_v7, 0.0  ;;  %v665_v14 = vmax.f32 %v600_v10, 0.0 }
 0x122   : > { %854 = vadd.xlane.f32.xlu0 %v730_v15 }
 0x123   : > { %v732_v20 = vmul.f32 %v1284_v42, %v664_v13  ;;  %v731_v21 = vmul.f32 %v1284_v42, %v663_v12  ;;  %v733_v22 = vmul.f32 %v1284_v42, %v665_v14 }
 0x124   : > { %v835_v26 = vpop.xlane.xlu2 %834  ;;  %v739_v27 = vpop.xlane.xlu1 %738 }
 0x125   : > { %v914_v29 = vadd.f32 %v1374_v32, %v835_v26  ;;  %v866_v31 = vadd.f32 %v1374_v32, %v739_v27  ;;  %v801_v33 = vpop.xlane.xlu0 %800 }
 0x126   : > { %v897_v35 = vadd.f32 %v1374_v32, %v801_v33 }
 0x127   : > { %979 = vst.msk [vmem:[%s1381_s16 + $0x190] sm:$0xff] %vm928_vm1, %v914_v29 }
 0x128   : > { %931 = vst.msk [vmem:[%s1381_s16 + $0x10] sm:$0xff] %vm928_vm1, %v866_v31 }
 0x129   : > { %962 = vst.msk [vmem:[%s1381_s16 + $0x108] sm:$0xff] %vm928_vm1, %v897_v35  ;;  %792 = vadd.xlane.f32.xlu2 %v699_v36  ;;  %760 = vadd.xlane.f32.xlu1 %v683_v37 }
 0x12a   : > { %824 = vadd.xlane.f32.xlu0 %v715_v39 }
 0x12c   : > { %v805_v47 = vpop.xlane.xlu2 %804  ;;  %v803_v48 = vpop.xlane.xlu1 %802 }
 0x12d   : > { %v899_v49 = vadd.f32 %v1374_v32, %v805_v47  ;;  %v898_v51 = vadd.f32 %v1374_v32, %v803_v48  ;;  %v771_v52 = vpop.xlane.xlu0 %770 }
 0x12e   : > { %v882_v55 = vadd.f32 %v1374_v32, %v771_v52 }
 0x12f   : > { %964 = vst.msk [vmem:[%s1381_s16 + $0x118] sm:$0xff] %vm928_vm1, %v899_v49 }
 0x130   : > { %963 = vst.msk [vmem:[%s1381_s16 + $0x110] sm:$0xff] %vm928_vm1, %v898_v51 }
 0x131   : > { %947 = vst.msk [vmem:[%s1381_s16 + $0x90] sm:$0xff] %vm928_vm1, %v882_v55  ;;  %762 = vadd.xlane.f32.xlu2 %v684_v53  ;;  %826 = vadd.xlane.f32.xlu1 %v716_v54 }
 0x132   : > { %794 = vadd.xlane.f32.xlu0 %v700_v56 }
 0x134   : > { %v743_v63 = vpop.xlane.xlu2 %742  ;;  %v741_v0 = vpop.xlane.xlu1 %740 }
 0x135   : > { %v868_v2 = vadd.f32 %v1374_v32, %v743_v63  ;;  %v867_v3 = vadd.f32 %v1374_v32, %v741_v0  ;;  %v837_v4 = vpop.xlane.xlu0 %836 }
 0x136   : > { %v915_v5 = vadd.f32 %v1374_v32, %v837_v4 }
 0x137   : > { %933 = vst.msk [vmem:[%s1381_s16 + $0x20] sm:$0xff] %vm928_vm1, %v868_v2 }
 0x138   : > { %932 = vst.msk [vmem:[%s1381_s16 + $0x18] sm:$0xff] %vm928_vm1, %v867_v3 }
 0x139   : > { %980 = vst.msk [vmem:[%s1381_s16 + $0x198] sm:$0xff] %vm928_vm1, %v915_v5  ;;  %828 = vadd.xlane.f32.xlu2 %v717_v8  ;;  %796 = vadd.xlane.f32.xlu1 %v701_v9 }
 0x13a   : > { %764 = vadd.xlane.f32.xlu0 %v685_v11 }
 0x13c   : > { %v775_v15 = vpop.xlane.xlu2 %774  ;;  %v773_v16 = vpop.xlane.xlu1 %772 }
 0x13d   : > { %v884_v17 = vadd.f32 %v1374_v32, %v775_v15  ;;  %v883_v38 = vadd.f32 %v1374_v32, %v773_v16  ;;  %v807_v18 = vpop.xlane.xlu0 %806 }
 0x13e   : > { %v900_v19 = vadd.f32 %v1374_v32, %v807_v18 }
 0x13f   : > { %949 = vst.msk [vmem:[%s1381_s16 + $0xa0] sm:$0xff] %vm928_vm1, %v884_v17 }
 0x140   : > { %948 = vst.msk [vmem:[%s1381_s16 + $0x98] sm:$0xff] %vm928_vm1, %v883_v38 }
 0x141   : > { %965 = vst.msk [vmem:[%s1381_s16 + $0x120] sm:$0xff] %vm928_vm1, %v900_v19  ;;  %858 = vadd.xlane.f32.xlu2 %v732_v20  ;;  %856 = vadd.xlane.f32.xlu1 %v731_v21 }
 0x142   : > { %860 = vadd.xlane.f32.xlu0 %v733_v22 }
 0x144   : > { %v745_v23 = vpop.xlane.xlu2 %744  ;;  %v839_v24 = vpop.xlane.xlu1 %838 }
 0x145   : > { %v869_v25 = vadd.f32 %v1374_v32, %v745_v23  ;;  %v916_v26 = vadd.f32 %v1374_v32, %v839_v24  ;;  %v777_v27 = vpop.xlane.xlu0 %776 }
 0x146   : > { %v885_v28 = vadd.f32 %v1374_v32, %v777_v27 }
 0x147   : > { %934 = vst.msk [vmem:[%s1381_s16 + $0x28] sm:$0xff] %vm928_vm1, %v869_v25 }
 0x148   : > { %981 = vst.msk [vmem:[%s1381_s16 + $0x1a0] sm:$0xff] %vm928_vm1, %v916_v26 }
 0x149   : > { %950 = vst.msk [vmem:[%s1381_s16 + $0xa8] sm:$0xff] %vm928_vm1, %v885_v28 }
 0x14c   : > { %v841_v42 = vpop.xlane.xlu2 %840  ;;  %v809_v29 = vpop.xlane.xlu1 %808 }
 0x14d   : > { %v917_v30 = vadd.f32 %v1374_v32, %v841_v42  ;;  %v901_v31 = vadd.f32 %v1374_v32, %v809_v29  ;;  %v747_v33 = vpop.xlane.xlu0 %746 }
 0x14e   : > { %v870_v34 = vadd.f32 %v1374_v32, %v747_v33 }
 0x14f   : > { %982 = vst.msk [vmem:[%s1381_s16 + $0x1a8] sm:$0xff] %vm928_vm1, %v917_v30 }
 0x150   : > { %966 = vst.msk [vmem:[%s1381_s16 + $0x128] sm:$0xff] %vm928_vm1, %v901_v31 }
 0x151   : > { %935 = vst.msk [vmem:[%s1381_s16 + $0x30] sm:$0xff] %vm928_vm1, %v870_v34 }
 0x154   : > { %v811_v35 = vpop.xlane.xlu2 %810  ;;  %v779_v36 = vpop.xlane.xlu1 %778 }
 0x155   : > { %v902_v37 = vadd.f32 %v1374_v32, %v811_v35  ;;  %v886_v39 = vadd.f32 %v1374_v32, %v779_v36  ;;  %v843_v40 = vpop.xlane.xlu0 %842 }
 0x156   : > { %v918_v41 = vadd.f32 %v1374_v32, %v843_v40 }
 0x157   : > { %967 = vst.msk [vmem:[%s1381_s16 + $0x130] sm:$0xff] %vm928_vm1, %v902_v37 }
 0x158   : > { %951 = vst.msk [vmem:[%s1381_s16 + $0xb0] sm:$0xff] %vm928_vm1, %v886_v39 }
 0x159   : > { %983 = vst.msk [vmem:[%s1381_s16 + $0x1b0] sm:$0xff] %vm928_vm1, %v918_v41 }
 0x15c   : > { %v781_v43 = vpop.xlane.xlu2 %780  ;;  %v749_v44 = vpop.xlane.xlu1 %748 }
 0x15d   : > { %v887_v45 = vadd.f32 %v1374_v32, %v781_v43  ;;  %v871_v46 = vadd.f32 %v1374_v32, %v749_v44  ;;  %v813_v47 = vpop.xlane.xlu0 %812 }
 0x15e   : > { %v903_v48 = vadd.f32 %v1374_v32, %v813_v47 }
 0x15f   : > { %952 = vst.msk [vmem:[%s1381_s16 + $0xb8] sm:$0xff] %vm928_vm1, %v887_v45 }
 0x160   : > { %936 = vst.msk [vmem:[%s1381_s16 + $0x38] sm:$0xff] %vm928_vm1, %v871_v46 }
 0x161   : > { %968 = vst.msk [vmem:[%s1381_s16 + $0x138] sm:$0xff] %vm928_vm1, %v903_v48 }
 0x164   : > { %v751_v49 = vpop.xlane.xlu2 %750  ;;  %v845_v50 = vpop.xlane.xlu1 %844 }
 0x165   : > { %v872_v51 = vadd.f32 %v1374_v32, %v751_v49  ;;  %v919_v52 = vadd.f32 %v1374_v32, %v845_v50  ;;  %v783_v53 = vpop.xlane.xlu0 %782 }
 0x166   : > { %v888_v54 = vadd.f32 %v1374_v32, %v783_v53 }
 0x167   : > { %937 = vst.msk [vmem:[%s1381_s16 + $0x40] sm:$0xff] %vm928_vm1, %v872_v51 }
 0x168   : > { %984 = vst.msk [vmem:[%s1381_s16 + $0x1b8] sm:$0xff] %vm928_vm1, %v919_v52 }
 0x169   : > { %953 = vst.msk [vmem:[%s1381_s16 + $0xc0] sm:$0xff] %vm928_vm1, %v888_v54 }
 0x16c   : > { %v847_v55 = vpop.xlane.xlu2 %846  ;;  %v815_v56 = vpop.xlane.xlu1 %814 }
 0x16d   : > { %v920_v57 = vadd.f32 %v1374_v32, %v847_v55  ;;  %v904_v58 = vadd.f32 %v1374_v32, %v815_v56  ;;  %v753_v59 = vpop.xlane.xlu0 %752 }
 0x16e   : > { %v873_v60 = vadd.f32 %v1374_v32, %v753_v59 }
 0x16f   : > { %985 = vst.msk [vmem:[%s1381_s16 + $0x1c0] sm:$0xff] %vm928_vm1, %v920_v57 }
 0x170   : > { %969 = vst.msk [vmem:[%s1381_s16 + $0x140] sm:$0xff] %vm928_vm1, %v904_v58 }
 0x171   : > { %938 = vst.msk [vmem:[%s1381_s16 + $0x48] sm:$0xff] %vm928_vm1, %v873_v60 }
 0x174   : > { %v817_v61 = vpop.xlane.xlu2 %816  ;;  %v785_v62 = vpop.xlane.xlu1 %784 }
 0x175   : > { %v905_v63 = vadd.f32 %v1374_v32, %v817_v61  ;;  %v889_v0 = vadd.f32 %v1374_v32, %v785_v62  ;;  %v849_v1 = vpop.xlane.xlu0 %848 }
 0x176   : > { %v921_v2 = vadd.f32 %v1374_v32, %v849_v1 }
 0x177   : > { %970 = vst.msk [vmem:[%s1381_s16 + $0x148] sm:$0xff] %vm928_vm1, %v905_v63 }
 0x178   : > { %954 = vst.msk [vmem:[%s1381_s16 + $0xc8] sm:$0xff] %vm928_vm1, %v889_v0 }
 0x179   : > { %986 = vst.msk [vmem:[%s1381_s16 + $0x1c8] sm:$0xff] %vm928_vm1, %v921_v2 }
 0x17c   : > { %v787_v3 = vpop.xlane.xlu2 %786  ;;  %v755_v4 = vpop.xlane.xlu1 %754 }
 0x17d   : > { %v890_v5 = vadd.f32 %v1374_v32, %v787_v3  ;;  %v874_v6 = vadd.f32 %v1374_v32, %v755_v4  ;;  %v819_v7 = vpop.xlane.xlu0 %818 }
 0x17e   : > { %v906_v8 = vadd.f32 %v1374_v32, %v819_v7 }
 0x17f   : > { %955 = vst.msk [vmem:[%s1381_s16 + $0xd0] sm:$0xff] %vm928_vm1, %v890_v5 }
 0x180   : > { %939 = vst.msk [vmem:[%s1381_s16 + $0x50] sm:$0xff] %vm928_vm1, %v874_v6 }
 0x181   : > { %971 = vst.msk [vmem:[%s1381_s16 + $0x150] sm:$0xff] %vm928_vm1, %v906_v8 }
 0x184   : > { %v757_v9 = vpop.xlane.xlu2 %756  ;;  %v851_v10 = vpop.xlane.xlu1 %850 }
 0x185   : > { %v875_v11 = vadd.f32 %v1374_v32, %v757_v9  ;;  %v922_v12 = vadd.f32 %v1374_v32, %v851_v10  ;;  %v789_v13 = vpop.xlane.xlu0 %788 }
 0x186   : > { %v891_v14 = vadd.f32 %v1374_v32, %v789_v13 }
 0x187   : > { %940 = vst.msk [vmem:[%s1381_s16 + $0x58] sm:$0xff] %vm928_vm1, %v875_v11 }
 0x188   : > { %987 = vst.msk [vmem:[%s1381_s16 + $0x1d0] sm:$0xff] %vm928_vm1, %v922_v12 }
 0x189   : > { %956 = vst.msk [vmem:[%s1381_s16 + $0xd8] sm:$0xff] %vm928_vm1, %v891_v14 }
 0x18c   : > { %v853_v15 = vpop.xlane.xlu2 %852  ;;  %v821_v16 = vpop.xlane.xlu1 %820 }
 0x18d   : > { %v923_v17 = vadd.f32 %v1374_v32, %v853_v15  ;;  %v907_v38 = vadd.f32 %v1374_v32, %v821_v16  ;;  %v759_v18 = vpop.xlane.xlu0 %758 }
 0x18e   : > { %v876_v19 = vadd.f32 %v1374_v32, %v759_v18 }
 0x18f   : > { %988 = vst.msk [vmem:[%s1381_s16 + $0x1d8] sm:$0xff] %vm928_vm1, %v923_v17 }
 0x190   : > { %972 = vst.msk [vmem:[%s1381_s16 + $0x158] sm:$0xff] %vm928_vm1, %v907_v38 }
 0x191   : > { %941 = vst.msk [vmem:[%s1381_s16 + $0x60] sm:$0xff] %vm928_vm1, %v876_v19 }
 0x194   : > { %v823_v20 = vpop.xlane.xlu2 %822  ;;  %v791_v21 = vpop.xlane.xlu1 %790 }
 0x195   : > { %v908_v22 = vadd.f32 %v1374_v32, %v823_v20  ;;  %v892_v23 = vadd.f32 %v1374_v32, %v791_v21  ;;  %v855_v24 = vpop.xlane.xlu0 %854 }
 0x196   : > { %v924_v25 = vadd.f32 %v1374_v32, %v855_v24 }
 0x197   : > { %973 = vst.msk [vmem:[%s1381_s16 + $0x160] sm:$0xff] %vm928_vm1, %v908_v22 }
 0x198   : > { %957 = vst.msk [vmem:[%s1381_s16 + $0xe0] sm:$0xff] %vm928_vm1, %v892_v23 }
 0x199   : > { %989 = vst.msk [vmem:[%s1381_s16 + $0x1e0] sm:$0xff] %vm928_vm1, %v924_v25 }
 0x19c   : > { %v793_v26 = vpop.xlane.xlu2 %792  ;;  %v761_v27 = vpop.xlane.xlu1 %760 }
 0x19d   : > { %v893_v28 = vadd.f32 %v1374_v32, %v793_v26  ;;  %v877_v42 = vadd.f32 %v1374_v32, %v761_v27  ;;  %v825_v29 = vpop.xlane.xlu0 %824 }
 0x19e   : > { %v909_v30 = vadd.f32 %v1374_v32, %v825_v29 }
 0x19f   : > { %958 = vst.msk [vmem:[%s1381_s16 + $0xe8] sm:$0xff] %vm928_vm1, %v893_v28 }
 0x1a0   : > { %942 = vst.msk [vmem:[%s1381_s16 + $0x68] sm:$0xff] %vm928_vm1, %v877_v42 }
 0x1a1   : > { %974 = vst.msk [vmem:[%s1381_s16 + $0x168] sm:$0xff] %vm928_vm1, %v909_v30 }
 0x1a4   : > { %v763_v31 = vpop.xlane.xlu2 %762  ;;  %v827_v33 = vpop.xlane.xlu1 %826 }
 0x1a5   : > { %v878_v34 = vadd.f32 %v1374_v32, %v763_v31  ;;  %v910_v35 = vadd.f32 %v1374_v32, %v827_v33  ;;  %v795_v36 = vpop.xlane.xlu0 %794 }
 0x1a6   : > { %v894_v37 = vadd.f32 %v1374_v32, %v795_v36 }
 0x1a7   : > { %943 = vst.msk [vmem:[%s1381_s16 + $0x70] sm:$0xff] %vm928_vm1, %v878_v34 }
 0x1a8   : > { %975 = vst.msk [vmem:[%s1381_s16 + $0x170] sm:$0xff] %vm928_vm1, %v910_v35 }
 0x1a9   : > { %959 = vst.msk [vmem:[%s1381_s16 + $0xf0] sm:$0xff] %vm928_vm1, %v894_v37 }
 0x1ac   : > { %v829_v39 = vpop.xlane.xlu2 %828  ;;  %v797_v40 = vpop.xlane.xlu1 %796 }
 0x1ad   : > { %v911_v41 = vadd.f32 %v1374_v32, %v829_v39  ;;  %v895_v43 = vadd.f32 %v1374_v32, %v797_v40  ;;  %v765_v44 = vpop.xlane.xlu0 %764 }
 0x1ae   : > { %v879_v45 = vadd.f32 %v1374_v32, %v765_v44 }
 0x1af   : > { %976 = vst.msk [vmem:[%s1381_s16 + $0x178] sm:$0xff] %vm928_vm1, %v911_v41 }
 0x1b0   : > { %960 = vst.msk [vmem:[%s1381_s16 + $0xf8] sm:$0xff] %vm928_vm1, %v895_v43 }
 0x1b1   : > { %944 = vst.msk [vmem:[%s1381_s16 + $0x78] sm:$0xff] %vm928_vm1, %v879_v45 }
 0x1b4   : > { %v859_v46 = vpop.xlane.xlu2 %858  ;;  %v857_v47 = vpop.xlane.xlu1 %856 }
 0x1b5   : > { %v926_v48 = vadd.f32 %v1374_v32, %v859_v46  ;;  %v925_v49 = vadd.f32 %v1374_v32, %v857_v47  ;;  %v861_v50 = vpop.xlane.xlu0 %860 }
 0x1b6   : > { %v927_v51 = vadd.f32 %v1374_v32, %v861_v50 }
 0x1b7   : > { %991 = vst.msk [vmem:[%s1381_s16 + $0x1f0] sm:$0xff] %vm928_vm1, %v926_v48 }
 0x1b8   : > { %990 = vst.msk [vmem:[%s1381_s16 + $0x1e8] sm:$0xff] %vm928_vm1, %v925_v49 }
 0x1b9   : > { %992 = vst.msk [vmem:[%s1381_s16 + $0x1f8] sm:$0xff] %vm928_vm1, %v927_v51 }
 0x1ba PF: > { %s16_s20 = sadd.s32 1, %s1114_s20  }
 0x1bb   : > { %p13_p4 = scmp.ge.s32.totalorder %s16_s20, 4  }
 0x1bd   :  { %15 = sbr.rel (!%p13_p4) target bundleno = 2 (0x2), region = 70 }

</bundles_post_ra>
